<compile_context>
chip_gen: v6e
topology: v6e:2x2x1
jax: 0.10.0
libtpu: 0.0.40
codegen_flags: <defaults>
</compile_context>

<pallas_src>
import jax
import jax.numpy as jnp
from jax.experimental import pallas as pl
from jax.experimental.pallas import tpu as pltpu

HEAD_DIMS = (41, 17, 17, 9)          # linear1..linear4 output features
TOTAL_OUT = sum(HEAD_DIMS)           # 84
OUT_PAD = 128                        # one full lane width (lane-dense output)
_ROW_ALIGN = 8                       # f32 sublane granularity for batch tiles


def _round_up(x, m):
    return (x + m - 1) // m * m


def _xavier_uniform(key, fan_out, fan_in, dtype=jnp.float32):
    # torch.nn.init.xavier_uniform_ on a (fan_out, fan_in) weight.
    limit = jnp.sqrt(6.0 / (fan_in + fan_out)).astype(dtype)
    return jax.random.uniform(key, (fan_out, fan_in), dtype=dtype,
                              minval=-limit, maxval=limit)


def init_params(key, input_dim):
    """Parameter init matching the PyTorch module's __init__ (xavier + 0.01 bias)."""
    keys = jax.random.split(key, len(HEAD_DIMS))
    weights, biases = [], []
    for k, out_dim in zip(keys, HEAD_DIMS):
        weights.append(_xavier_uniform(k, out_dim, input_dim))  # (out, D) torch layout
        biases.append(jnp.full((out_dim,), 0.01, dtype=jnp.float32))
    return weights, biases


def pack_params(weights, biases, input_dim):
    """Pack the 4 heads into one (D, 128) bf16 weight and (1, 128) f32 bias.
    Note: weights are quantized to bf16 once at pack time (matmul accumulates
    in f32); keep the original f32 weights around if exact f32 parity is needed."""
    # PyTorch Linear computes x @ W.T + b, so transpose each weight.
    w_cat = jnp.concatenate([w.T for w in weights], axis=1)   # (D, 84) f32
    b_cat = jnp.concatenate(biases, axis=0)                   # (84,)
    w_pad = jnp.zeros((input_dim, OUT_PAD), jnp.float32).at[:, :TOTAL_OUT].set(w_cat)
    b_pad = jnp.zeros((1, OUT_PAD), jnp.float32).at[:, :TOTAL_OUT].set(b_cat)
    return w_pad.astype(jnp.bfloat16), b_pad


def _fused_linear_kernel(x_ref, w_ref, b_ref, o_ref):
    # Fused f32->bf16 cast on the VPU (free under the MXU/DMA), so x is read
    # from HBM exactly once at 4 B/elt with no wrapper-side astype round trip.
    x_bf = x_ref[...].astype(jnp.bfloat16)
    o_ref[...] = (
        jnp.dot(x_bf, w_ref[...], preferred_element_type=jnp.float32)
        + b_ref[...]
    )


def _vmem_capacity_bytes():
    """Physical per-core VMEM (128 MiB v5e/v6e, 64 MiB v7x)."""
    try:
        return int(pltpu.get_tpu_info().vmem_capacity_bytes)
    except Exception:
        return 64 * 1024 * 1024   # conservative fallback (smallest: v7x)


def _tile_footprint_bytes(tb, input_dim, x_bufs=2):
    return (x_bufs * tb * input_dim * 4        # pipelined f32 x tiles
            + 2 * tb * OUT_PAD * 4             # double-buffered f32 out tiles
            + input_dim * OUT_PAD * 2          # resident bf16 packed weight (once)
            + OUT_PAD * 4)                     # resident f32 bias


def _choose_batch_tile(batch, input_dim, vmem_budget):
    """Batch tile: big enough to amortize per-step overhead, small enough to fit
    the generation's VMEM, and capped so the grid has >= 2 balanced tiles (so
    both v7x TensorCores participate via dimension_semantics=('parallel',))."""
    tb = min(1024, _round_up(batch, _ROW_ALIGN))
    if batch >= 2 * _ROW_ALIGN:
        tb = min(tb, _round_up(pl.cdiv(batch, 2), _ROW_ALIGN))
    while tb > _ROW_ALIGN and _tile_footprint_bytes(tb, input_dim) > vmem_budget:
        tb = max(_ROW_ALIGN, _round_up(tb // 2, _ROW_ALIGN))
    return tb


def _block_spec(block_shape, index_map, buffers=None):
    """BlockSpec with an optional explicit buffer count; falls back cleanly if
    this Pallas build has no pipeline_mode / pl.Buffered support."""
    if buffers is not None and hasattr(pl, "Buffered"):
        try:
            return pl.BlockSpec(block_shape, index_map,
                                pipeline_mode=pl.Buffered(buffers))
        except TypeError:
            pass
    return pl.BlockSpec(block_shape, index_map)


def essay_scoring_forward_packed(x, w_bf16, b_pad):
    """Fused 4-head linear. Returns the lane-dense (batch, 128) f32 slab:
    heads at [:, 0:41], [:, 41:58], [:, 58:75], [:, 75:84]."""
    batch, input_dim = x.shape

    vmem_cap = _vmem_capacity_bytes()
    # Leave headroom below physical capacity (also covers a possible second
    # compiler-side buffer for the constant-index weight block).
    vmem_budget = max(vmem_cap - (16 << 20), (vmem_cap * 3) // 4)
    tb = _choose_batch_tile(batch, input_dim, vmem_budget)

    # Ragged last block instead of padding: no jnp.pad HBM round trip and no
    # duplicated DMA/MXU work; Pallas masks the boundary stores.
    grid = (pl.cdiv(batch, tb),)

    # Deeper x buffering only when a very large hidden size forced tb down
    # (short per-tile matmuls then hide DMA issue latency less well).
    x_bufs = None
    if tb < 512 and input_dim >= 2048 and \
            _tile_footprint_bytes(tb, input_dim, 3) <= vmem_budget:
        x_bufs = 3

    cost = pl.CostEstimate(
        flops=2 * batch * input_dim * OUT_PAD,
        transcendentals=0,
        bytes_accessed=(batch * input_dim * 4             # x (f32, read once)
                        + input_dim * OUT_PAD * 2         # packed weight (bf16)
                        + OUT_PAD * 4                     # bias (f32)
                        + batch * OUT_PAD * 4),           # output (f32)
    )

    vmem_need = _tile_footprint_bytes(tb, input_dim, x_bufs or 2)
    vmem_limit = int(min(max(vmem_need + (4 << 20), 16 << 20), vmem_cap))

    out = pl.pallas_call(
        _fused_linear_kernel,
        out_shape=jax.ShapeDtypeStruct((batch, OUT_PAD), jnp.float32),
        grid=grid,
        in_specs=[
            # x streams in batch tiles (pipelined; ragged last block).
            _block_spec((tb, input_dim), lambda i: (i, 0), buffers=x_bufs),
            # Packed weight and bias stay resident across the whole grid.
            pl.BlockSpec((input_dim, OUT_PAD), lambda i: (0, 0)),
            pl.BlockSpec((1, OUT_PAD), lambda i: (0, 0)),
        ],
        out_specs=pl.BlockSpec((tb, OUT_PAD), lambda i: (i, 0)),
        compiler_params=pltpu.CompilerParams(
            dimension_semantics=("parallel",),   # megacore sharding on v7x
            vmem_limit_bytes=vmem_limit,         # clamped to physical VMEM
        ),
        cost_estimate=cost,
    )(x, w_bf16, b_pad)

    return out


@jax.jit
def essay_scoring_forward(x, w_bf16, b_pad):
    """Matches EssayScoringModel.forward: returns the four head outputs.
    (Prefer essay_scoring_forward_packed downstream: the four narrow 41/17/17/9
    slices below are wrapper-side XLA copies with sub-128-lane stores.)"""
    slab = essay_scoring_forward_packed(x, w_bf16, b_pad)
    o1 = slab[:, 0:41]
    o2 = slab[:, 41:58]
    o3 = slab[:, 58:75]
    o4 = slab[:, 75:84]
    return o1, o2, o3, o4


if __name__ == "__main__":
    batch = 8
    input_dim = 32  # stands in for model.config.hidden_size

    key = jax.random.PRNGKey(0)
    k_params, k_x = jax.random.split(key)

    weights, biases = init_params(k_params, input_dim)
    w_bf16, b_pad = pack_params(weights, biases, input_dim)

    x = jax.random.normal(k_x, (batch, input_dim), dtype=jnp.float32)

    outs = essay_scoring_forward(x, w_bf16, b_pad)
    jax.block_until_ready(outs)
    o1, o2, o3, o4 = outs

    # Cross-check against a plain-JAX f32 reference of the PyTorch forward.
    # (bf16 weights/activations with f32 accumulation -> ~1e-2 rel tolerance.)
    refs = [x @ w.T + b for w, b in zip(weights, biases)]
    for got, ref in zip((o1, o2, o3, o4), refs):
        assert got.shape == ref.shape, (got.shape, ref.shape)
        assert jnp.allclose(got, ref, atol=3e-2, rtol=3e-2), (
            float(jnp.max(jnp.abs(got - ref))))

    print("KERNEL_OK")
</pallas_src>

<mosaic_0001>
module attributes {stable_mosaic.version = 11 : i64} {
  func.func @_fused_linear_kernel(%arg0: i32, %arg1: memref<8x32xf32, #tpu.memory_space<vmem>>, %arg2: memref<32x128xbf16, #tpu.memory_space<vmem>>, %arg3: memref<1x128xf32, #tpu.memory_space<vmem>>, %arg4: memref<8x128xf32, #tpu.memory_space<vmem>>) attributes {dimension_semantics = [#tpu.dimension_semantics<parallel>], iteration_bounds = array<i64: 1>, scalar_prefetch = 0 : i64, scratch_operands = 0 : i64, tpu.core_type = #tpu.core_type<tc>, window_params = [{transform_indices = @transform_0, window_bounds = array<i64: 8, 32>}, {pipeline_mode = #tpu.pipeline_mode<synchronous>, transform_indices = @transform_1, window_bounds = array<i64: 32, 128>}, {pipeline_mode = #tpu.pipeline_mode<synchronous>, transform_indices = @transform_2, window_bounds = array<i64: 1, 128>}, {transform_indices = @transform_3, window_bounds = array<i64: 8, 128>}]} {
    %c0 = arith.constant 0 : index
    %c0_0 = arith.constant 0 : index
    %0 = vector.load %arg1[%c0, %c0_0] : memref<8x32xf32, #tpu.memory_space<vmem>>, vector<8x32xf32>
    %1 = arith.truncf %0 : vector<8x32xf32> to vector<8x32xbf16>
    %c0_1 = arith.constant 0 : index
    %c0_2 = arith.constant 0 : index
    %2 = vector.load %arg2[%c0_1, %c0_2] : memref<32x128xbf16, #tpu.memory_space<vmem>>, vector<32x128xbf16>
    %cst = arith.constant dense<0.000000e+00> : vector<8x128xf32>
    %3 = tpu.matmul %1, %2, %cst {dimension_numbers = #tpu.dot_dimension_numbers<[1], [0], [0], [1], [0, 0, 1, 1], [], []>} : vector<8x32xbf16>, vector<32x128xbf16>, vector<8x128xf32> -> vector<8x128xf32>
    %c0_3 = arith.constant 0 : index
    %c0_4 = arith.constant 0 : index
    %4 = vector.load %arg3[%c0_3, %c0_4] : memref<1x128xf32, #tpu.memory_space<vmem>>, vector<1x128xf32>
    %5 = vector.broadcast %4 : vector<1x128xf32> to vector<8x128xf32>
    %6 = arith.addf %3, %5 : vector<8x128xf32>
    %c0_5 = arith.constant 0 : index
    %c0_6 = arith.constant 0 : index
    %7 = vector.load %arg4[%c0_5, %c0_6] : memref<8x128xf32, #tpu.memory_space<vmem>>, vector<8x128xf32>
    tpu.vector_store %arg4[%c0_5, %c0_6], %6 {strides = array<i32>} : memref<8x128xf32, #tpu.memory_space<vmem>>, vector<8x128xf32>,
    return
  }
  func.func @transform_0(%arg0: i32) -> (i32, i32) {
    %c0_i32 = arith.constant 0 : i32
    %c0_i32_0 = arith.constant 0 : i32
    return %arg0, %c0_i32 : i32, i32
  }
  func.func @transform_1(%arg0: i32) -> (i32, i32) {
    %c0_i32 = arith.constant 0 : i32
    %c0_i32_0 = arith.constant 0 : i32
    %c0_i32_1 = arith.constant 0 : i32
    return %c0_i32, %c0_i32_0 : i32, i32
  }
  func.func @transform_2(%arg0: i32) -> (i32, i32) {
    %c0_i32 = arith.constant 0 : i32
    %c0_i32_0 = arith.constant 0 : i32
    %c0_i32_1 = arith.constant 0 : i32
    return %c0_i32, %c0_i32_0 : i32, i32
  }
  func.func @transform_3(%arg0: i32) -> (i32, i32) {
    %c0_i32 = arith.constant 0 : i32
    %c0_i32_0 = arith.constant 0 : i32
    return %arg0, %c0_i32 : i32, i32
  }
}

</mosaic_0001>

<bundles_post_ra>
// kernel: essay_scoring_forward.1
= control target key start
LH: loop header
LB: loop body
LE: loop exit
PB: predicated region body
PF: predicated region fallthrough
CT: control target
= control target key end

     0   :  { %8 = vsyncpa [#allocation3], 0  ;;  %s222_s0 = inlined_call_operand.hbm [shape: f32[8,32], index: 0, kind: input, shape index: {}]   ;;  %s223_s1 = inlined_call_operand.hbm [shape: bf16[32,128], index: 1, kind: input, shape index: {}]   ;;  %s224_s2 = inlined_call_operand.vmem [shape: f32[1,128], index: 2, kind: input, shape index: {}]   ;;  %s225_s3 = inlined_call_operand.vmem [shape: f32[8,128], index: 3, kind: output, shape index: {}]  }
   0x1   :  { %9 = vsyncpa [#allocation5], 0  ;;  %s184_s12 = smov [#allocation2]   ;;  %s185_s14 = smov [#allocation4]  }
   0x2   :  { %s16_s13 = sshll.u32 %s184_s12, 4  ;;  %s25_s15 = sshll.u32 %s185_s14, 4  ;;  %s17_s13 = int_to_ptr.vmem [resolvable:$true] %s16_s13  ;;  %s26_s15 = int_to_ptr.vmem [resolvable:$true] %s25_s15 }
   0x3   :  { %s148_s16 = scalar_lea.vmem %s17_s13, 128  ;;  %p153_p1 = scmp.lt.s32.totalorder %s17_s13, %s17_s13 }
   0x4   :  { %p149_p0 = scmp.ne.s32.totalorder %s17_s13, %s148_s16  ;;  %p154_p2 = scmp.lt.s32.totalorder %s148_s16, %s148_s16 }
   0x6   :  { %p155_p3 = por %p154_p2, %p153_p1 }
   0x8   :  { %p156_p4 = pnand %p155_p3, %p149_p0 }
   0xa   :  { %159 = shalt.err (!%p156_p4)
}
   0xb   :  { %19 = dma.hbm_to_vmem [thread:$0]  %s222_s0, 128, %s17_s13, [#allocation3]  }
   0xc   :  { %s168_s19 = scalar_lea.vmem %s26_s15, 256  ;;  %p173_p6 = scmp.lt.s32.totalorder %s26_s15, %s26_s15 }
   0xd   :  { %p169_p5 = scmp.ne.s32.totalorder %s26_s15, %s168_s19  ;;  %p174_p7 = scmp.lt.s32.totalorder %s168_s19, %s168_s19 }
   0xf   :  { %p175_p8 = por %p174_p7, %p173_p6 }
  0x11   :  { %p176_p9 = pnand %p175_p8, %p169_p5 }
  0x13   :  { %179 = shalt.err (!%p176_p9)
}
  0x14   :  { %s186_s20 = smov 64   ;;  %s187_s21 = smov 4  }
  0x15   :  { %31 = dma.hbm_to_vmem [thread:$0]  %s223_s1, 256, %s26_s15, [#allocation5], %s186_s20, %s186_s20, %s187_s21  }
  0x16   :  { %180 = dma.done.wait [#allocation3], 128  }
  0x17   :  { %181 = vsyncadd [#allocation3], 4294967168 }
  0x18   :  { %182 = dma.done.wait [#allocation5], 256  }
  0x19   :  { %183 = vsyncadd [#allocation5], 4294967040  ;;  %v188_v0 = vmov 0.0   ;;  %vm189_vm0 = vmmov 0   ;;  %v138_v1 = vld [vmem:[#allocation4 + $0x8] sm:$0xff]   ;;  %v139_v2 = vld [vmem:[#allocation4] sm:$0xff]  }
  0x1a   :  { %124 = vmatprep.subr.bf16.mxu0 %v188_v0  ;;  %128 = vmatprep.mubr.msk.bf16.mxu0 %vm189_vm0, %v188_v0  ;;  %v41_v3 = vld [vmem:[#allocation2] sm:$0xff]  ;;  %vm66_vm1 = vcmask 261120  }
  0x1b   :  { %125 = vmatpush3.bf16.msra.mxu0 %v138_v1  ;;  %v42_v4 = vpack.c.bf16 %v41_v3, %v41_v3  ;;  %v117_v5 = vld [vmem:[%s224_s2] ss:$0 sm:$0xff] }
  0x1c   :  { %126 = vmatprep.subr.bf16.mxu0 %v188_v0 }
  0x1f   :  { %127 = vmatpush3.bf16.msra.mxu0 %v139_v2 }
  0x22   :  { %129 = vmatmul.mubr.msk.bf16.vlgmr.msra.gmra.mxu0 %vm66_vm1, %v42_v4 }
  0xe2   :  { %v104_v6 = vpop.f32.mrf.mxu0 }
  0xe3   :  { %v105_v7 = vadd.f32 %v117_v5, %v104_v6 }
  0xe4   :  { %v130_v8 = vpop.f32.mrf.mxu0 }
  0xe5   :  { %110 = vst [vmem:[%s225_s3] sm:$0xff] %v105_v7 }
  0xe6   :  { %v107_v9 = vpop.f32.mrf.mxu0 }
  0xe8   :  { %v131_v10 = vpop.f32.mrf.mxu0 }
  0xe9   :  { %115 = vsyncpa [#allocation3], 1 }
  0xea   :  { %116 = vsyncpa [#allocation5], 1 }

</bundles_post_ra>
